<compile_context>
chip_gen: v7x
topology: tpu7x:2x2x1
jax: 0.10.0
libtpu: 0.0.40
codegen_flags: <defaults>
</compile_context>

<pallas_src>
import jax
import jax.numpy as jnp
from jax.experimental import pallas as pl
from jax.experimental.pallas import tpu as pltpu
import numpy as np

IN_DIM = 64
HID = 16
OUT_DIM = 2
PAD = 128                      # lane padding for hidden/output widths inside VMEM

# Packed parameter slabs:
#   wslab: (448, 128) bf16
#     rows   0: 64 -> W1  (64 x 128), real cols 0:16
#     rows  64:192 -> W2  (128 x 128), real block [0:16, 0:16]
#     rows 192:320 -> W3  (128 x 128), real block [0:16, 0:16]
#     rows 320:448 -> W4  (128 x 128), real block [0:16, 0:2]
#   bslab: (8, 128) f32, rows 0..3 = b1..b4 (zero padded to 128 lanes)
W_SLAB_SHAPE = (448, PAD)
B_SLAB_SHAPE = (8, PAD)


def mlp_kernel(x_ref, w_ref, b_ref, o_ref):
    # Activations: bf16 matmul operands, f32 accumulation + bias/ReLU epilogue.
    x = x_ref[...].astype(jnp.bfloat16)                      # (tb, 64)

    w1 = w_ref[0:64, :]                                      # (64, 128) bf16
    w2 = w_ref[64:192, :]                                    # (128,128) bf16
    w3 = w_ref[192:320, :]
    w4 = w_ref[320:448, :]
    b1 = b_ref[0:1, :]                                       # (1, 128) f32
    b2 = b_ref[1:2, :]
    b3 = b_ref[2:3, :]
    b4 = b_ref[3:4, :]

    # Padded lanes stay exactly zero through every layer (zero W cols / b lanes,
    # relu(0)=0), so the 128-wide intermediates are numerically equivalent to
    # the 16-wide PyTorch layers.
    h = jnp.dot(x, w1, preferred_element_type=jnp.float32) + b1
    h = jnp.maximum(h, 0.0)
    h = jnp.dot(h.astype(jnp.bfloat16), w2, preferred_element_type=jnp.float32) + b2
    h = jnp.maximum(h, 0.0)
    h = jnp.dot(h.astype(jnp.bfloat16), w3, preferred_element_type=jnp.float32) + b3
    h = jnp.maximum(h, 0.0)
    y = jnp.dot(h.astype(jnp.bfloat16), w4, preferred_element_type=jnp.float32) + b4
    # Narrow store: only the 2 real output lanes go back to HBM.
    o_ref[...] = y[:, 0:OUT_DIM].astype(o_ref.dtype)


def _choose_tb(batch, tb_max=2048, min_steps=4):
    """Largest tile <= tb_max that still leaves >= min_steps grid steps
    (v7x megacore + pipelining), rounded up to a sublane multiple of 8."""
    tb = max(8, min(tb_max, -(-batch // min_steps)))
    return -(-tb // 8) * 8


def simple_mlp_forward(x, wslab, bslab, *, tb=None):
    """x: (B, 64) f32 or bf16; wslab/bslab: packed parameter slabs."""
    B = x.shape[0]
    if tb is None:
        tb = _choose_tb(B)
    nb = pl.cdiv(B, tb)

    return pl.pallas_call(
        mlp_kernel,
        out_shape=jax.ShapeDtypeStruct((B, OUT_DIM), jnp.float32),
        grid=(nb,),
        in_specs=[
            pl.BlockSpec((tb, IN_DIM), lambda i: (i, 0)),      # batch tile of x
            pl.BlockSpec(W_SLAB_SHAPE, lambda i: (0, 0)),      # bf16 weights (VMEM-resident)
            pl.BlockSpec(B_SLAB_SHAPE, lambda i: (0, 0)),      # f32 biases (VMEM-resident)
        ],
        out_specs=pl.BlockSpec((tb, OUT_DIM), lambda i: (i, 0)),
        compiler_params=pltpu.CompilerParams(
            dimension_semantics=("parallel",)),
    )(x, wslab, bslab)


def init_params(key):
    """Deterministic init mimicking nn.Linear default (uniform +-1/sqrt(fan_in)),
    stored as (in_features, out_features)."""
    sizes = [(IN_DIM, HID), (HID, HID), (HID, HID), (HID, OUT_DIM)]
    params = {}
    keys = jax.random.split(key, 2 * len(sizes))
    for idx, (fan_in, fan_out) in enumerate(sizes):
        bound = 1.0 / np.sqrt(fan_in)
        params[f"w{idx + 1}"] = jax.random.uniform(
            keys[2 * idx], (fan_in, fan_out), minval=-bound, maxval=bound,
            dtype=jnp.float32)
        params[f"b{idx + 1}"] = jax.random.uniform(
            keys[2 * idx + 1], (fan_out,), minval=-bound, maxval=bound,
            dtype=jnp.float32)
    return params


def pack_params(p):
    """Pack weights into one zero-padded bf16 slab and biases into a small f32 slab."""
    wslab = jnp.zeros(W_SLAB_SHAPE, jnp.bfloat16)
    wslab = wslab.at[0:64, 0:HID].set(p["w1"].astype(jnp.bfloat16))
    wslab = wslab.at[64:64 + HID, 0:HID].set(p["w2"].astype(jnp.bfloat16))
    wslab = wslab.at[192:192 + HID, 0:HID].set(p["w3"].astype(jnp.bfloat16))
    wslab = wslab.at[320:320 + HID, 0:OUT_DIM].set(p["w4"].astype(jnp.bfloat16))

    bslab = jnp.zeros(B_SLAB_SHAPE, jnp.float32)
    bslab = bslab.at[0, 0:HID].set(p["b1"])
    bslab = bslab.at[1, 0:HID].set(p["b2"])
    bslab = bslab.at[2, 0:HID].set(p["b3"])
    bslab = bslab.at[3, 0:OUT_DIM].set(p["b4"])
    return wslab, bslab


def reference_forward_bf16(x, p):
    """Reference with the same bf16-operand / f32-accumulate recipe as the kernel."""
    def layer(h, w, b, relu):
        y = jnp.dot(h.astype(jnp.bfloat16), w.astype(jnp.bfloat16),
                    preferred_element_type=jnp.float32) + b
        return jnp.maximum(y, 0.0) if relu else y
    h = layer(x, p["w1"], p["b1"], True)
    h = layer(h, p["w2"], p["b2"], True)
    h = layer(h, p["w3"], p["b3"], True)
    return layer(h, p["w4"], p["b4"], False)


def reference_forward_f32(x, p):
    h = jnp.maximum(x @ p["w1"] + p["b1"], 0.0)
    h = jnp.maximum(h @ p["w2"] + p["b2"], 0.0)
    h = jnp.maximum(h @ p["w3"] + p["b3"], 0.0)
    return h @ p["w4"] + p["b4"]


if __name__ == "__main__":
    key = jax.random.PRNGKey(0)
    k_x, k_p, k_x2 = jax.random.split(key, 3)

    params = init_params(k_p)
    wslab, bslab = pack_params(params)

    # Small batch: 8 flattened 8x8 "images", f32 (PyTorch-equivalent path).
    B = 8
    x = jax.random.normal(k_x, (B, IN_DIM), dtype=jnp.float32)
    out = jax.block_until_ready(simple_mlp_forward(x, wslab, bslab))

    ref_bf16 = reference_forward_bf16(x, params)
    np.testing.assert_allclose(np.asarray(out), np.asarray(ref_bf16),
                               rtol=1e-2, atol=1e-2)
    ref_f32 = reference_forward_f32(x, params)
    np.testing.assert_allclose(np.asarray(out), np.asarray(ref_f32),
                               rtol=5e-2, atol=5e-2)

    # Ragged, multi-tile batch: exercises the cdiv grid + clipped final block
    # (no wrapper-side jnp.pad) and the multi-step parallel axis.
    B2 = 1000
    x2 = jax.random.normal(k_x2, (B2, IN_DIM), dtype=jnp.float32)
    out2 = jax.block_until_ready(simple_mlp_forward(x2, wslab, bslab))
    ref2 = reference_forward_bf16(x2, params)
    np.testing.assert_allclose(np.asarray(out2), np.asarray(ref2),
                               rtol=1e-2, atol=1e-2)

    # Optional bf16 input path (halves the dominant HBM read); same kernel.
    out2_bf16 = jax.block_until_ready(
        simple_mlp_forward(x2.astype(jnp.bfloat16), wslab, bslab))
    ref2_bf16 = reference_forward_bf16(
        x2.astype(jnp.bfloat16).astype(jnp.float32), params)
    np.testing.assert_allclose(np.asarray(out2_bf16), np.asarray(ref2_bf16),
                               rtol=2e-2, atol=2e-2)

    # TODO(synk): forward-hook activation capture / matplotlib visualization is
    # host-side code, not kernel compute, and is intentionally omitted.

    print("KERNEL_OK")
</pallas_src>

<mosaic_0001>
module attributes {stable_mosaic.version = 11 : i64} {
  func.func @mlp_kernel(%arg0: i32, %arg1: memref<8x64xf32, #tpu.memory_space<vmem>>, %arg2: memref<448x128xbf16, #tpu.memory_space<vmem>>, %arg3: memref<8x128xf32, #tpu.memory_space<vmem>>, %arg4: memref<8x2xf32, #tpu.memory_space<vmem>>) attributes {dimension_semantics = [#tpu.dimension_semantics<parallel>], iteration_bounds = array<i64: 1>, scalar_prefetch = 0 : i64, scratch_operands = 0 : i64, tpu.core_type = #tpu.core_type<tc>, window_params = [{transform_indices = @transform_0, window_bounds = array<i64: 8, 64>}, {pipeline_mode = #tpu.pipeline_mode<synchronous>, transform_indices = @transform_1, window_bounds = array<i64: 448, 128>}, {pipeline_mode = #tpu.pipeline_mode<synchronous>, transform_indices = @transform_2, window_bounds = array<i64: 8, 128>}, {transform_indices = @transform_3, window_bounds = array<i64: 8, 2>}]} {
    %c0 = arith.constant 0 : index
    %c0_0 = arith.constant 0 : index
    %0 = vector.load %arg1[%c0, %c0_0] : memref<8x64xf32, #tpu.memory_space<vmem>>, vector<8x64xf32>
    %1 = arith.truncf %0 : vector<8x64xf32> to vector<8x64xbf16>
    %c0_1 = arith.constant 0 : index
    %c0_2 = arith.constant 0 : index
    %2 = vector.load %arg2[%c0_1, %c0_2] : memref<448x128xbf16, #tpu.memory_space<vmem>>, vector<64x128xbf16>
    %c64 = arith.constant 64 : index
    %c0_3 = arith.constant 0 : index
    %3 = vector.load %arg2[%c64, %c0_3] : memref<448x128xbf16, #tpu.memory_space<vmem>>, vector<128x128xbf16>
    %c192 = arith.constant 192 : index
    %c0_4 = arith.constant 0 : index
    %4 = vector.load %arg2[%c192, %c0_4] : memref<448x128xbf16, #tpu.memory_space<vmem>>, vector<128x128xbf16>
    %c320 = arith.constant 320 : index
    %c0_5 = arith.constant 0 : index
    %5 = vector.load %arg2[%c320, %c0_5] : memref<448x128xbf16, #tpu.memory_space<vmem>>, vector<128x128xbf16>
    %c0_6 = arith.constant 0 : index
    %c0_7 = arith.constant 0 : index
    %6 = vector.load %arg3[%c0_6, %c0_7] : memref<8x128xf32, #tpu.memory_space<vmem>>, vector<1x128xf32>
    %c1 = arith.constant 1 : index
    %c0_8 = arith.constant 0 : index
    %7 = vector.load %arg3[%c1, %c0_8] : memref<8x128xf32, #tpu.memory_space<vmem>>, vector<1x128xf32>
    %c2 = arith.constant 2 : index
    %c0_9 = arith.constant 0 : index
    %8 = vector.load %arg3[%c2, %c0_9] : memref<8x128xf32, #tpu.memory_space<vmem>>, vector<1x128xf32>
    %c3 = arith.constant 3 : index
    %c0_10 = arith.constant 0 : index
    %9 = vector.load %arg3[%c3, %c0_10] : memref<8x128xf32, #tpu.memory_space<vmem>>, vector<1x128xf32>
    %cst = arith.constant dense<0.000000e+00> : vector<8x128xf32>
    %10 = tpu.matmul %1, %2, %cst {dimension_numbers = #tpu.dot_dimension_numbers<[1], [0], [0], [1], [0, 0, 1, 1], [], []>} : vector<8x64xbf16>, vector<64x128xbf16>, vector<8x128xf32> -> vector<8x128xf32>
    %11 = vector.broadcast %6 : vector<1x128xf32> to vector<8x128xf32>
    %12 = arith.addf %10, %11 : vector<8x128xf32>
    %cst_11 = arith.constant 0.000000e+00 : f32
    %13 = vector.broadcast %cst_11 : f32 to vector<8x128xf32>
    %14 = arith.maximumf %12, %13 : vector<8x128xf32>
    %15 = arith.truncf %14 : vector<8x128xf32> to vector<8x128xbf16>
    %cst_12 = arith.constant dense<0.000000e+00> : vector<8x128xf32>
    %16 = tpu.matmul %15, %3, %cst_12 {dimension_numbers = #tpu.dot_dimension_numbers<[1], [0], [0], [1], [0, 0, 1, 1], [], []>} : vector<8x128xbf16>, vector<128x128xbf16>, vector<8x128xf32> -> vector<8x128xf32>
    %17 = vector.broadcast %7 : vector<1x128xf32> to vector<8x128xf32>
    %18 = arith.addf %16, %17 : vector<8x128xf32>
    %cst_13 = arith.constant 0.000000e+00 : f32
    %19 = vector.broadcast %cst_13 : f32 to vector<8x128xf32>
    %20 = arith.maximumf %18, %19 : vector<8x128xf32>
    %21 = arith.truncf %20 : vector<8x128xf32> to vector<8x128xbf16>
    %cst_14 = arith.constant dense<0.000000e+00> : vector<8x128xf32>
    %22 = tpu.matmul %21, %4, %cst_14 {dimension_numbers = #tpu.dot_dimension_numbers<[1], [0], [0], [1], [0, 0, 1, 1], [], []>} : vector<8x128xbf16>, vector<128x128xbf16>, vector<8x128xf32> -> vector<8x128xf32>
    %23 = vector.broadcast %8 : vector<1x128xf32> to vector<8x128xf32>
    %24 = arith.addf %22, %23 : vector<8x128xf32>
    %cst_15 = arith.constant 0.000000e+00 : f32
    %25 = vector.broadcast %cst_15 : f32 to vector<8x128xf32>
    %26 = arith.maximumf %24, %25 : vector<8x128xf32>
    %27 = arith.truncf %26 : vector<8x128xf32> to vector<8x128xbf16>
    %cst_16 = arith.constant dense<0.000000e+00> : vector<8x128xf32>
    %28 = tpu.matmul %27, %5, %cst_16 {dimension_numbers = #tpu.dot_dimension_numbers<[1], [0], [0], [1], [0, 0, 1, 1], [], []>} : vector<8x128xbf16>, vector<128x128xbf16>, vector<8x128xf32> -> vector<8x128xf32>
    %29 = vector.broadcast %9 : vector<1x128xf32> to vector<8x128xf32>
    %30 = arith.addf %28, %29 : vector<8x128xf32>
    %31 = vector.extract_strided_slice %30 {offsets = [0, 0], sizes = [8, 2], strides = [1, 1]} : vector<8x128xf32> to vector<8x2xf32>
    %c0_17 = arith.constant 0 : index
    %c0_18 = arith.constant 0 : index
    %32 = vector.load %arg4[%c0_17, %c0_18] : memref<8x2xf32, #tpu.memory_space<vmem>>, vector<8x2xf32>
    tpu.vector_store %arg4[%c0_17, %c0_18], %31 {strides = array<i32>} : memref<8x2xf32, #tpu.memory_space<vmem>>, vector<8x2xf32>,
    return
  }
  func.func @transform_0(%arg0: i32) -> (i32, i32) {
    %c0_i32 = arith.constant 0 : i32
    %c0_i32_0 = arith.constant 0 : i32
    return %arg0, %c0_i32 : i32, i32
  }
  func.func @transform_1(%arg0: i32) -> (i32, i32) {
    %c0_i32 = arith.constant 0 : i32
    %c0_i32_0 = arith.constant 0 : i32
    %c0_i32_1 = arith.constant 0 : i32
    return %c0_i32, %c0_i32_0 : i32, i32
  }
  func.func @transform_2(%arg0: i32) -> (i32, i32) {
    %c0_i32 = arith.constant 0 : i32
    %c0_i32_0 = arith.constant 0 : i32
    %c0_i32_1 = arith.constant 0 : i32
    return %c0_i32, %c0_i32_0 : i32, i32
  }
  func.func @transform_3(%arg0: i32) -> (i32, i32) {
    %c0_i32 = arith.constant 0 : i32
    %c0_i32_0 = arith.constant 0 : i32
    return %arg0, %c0_i32 : i32, i32
  }
}

</mosaic_0001>

<bundles_post_ra>
// kernel: tpu_custom_call.1
= control target key start
LH: loop header
LB: loop body
LE: loop exit
PB: predicated region body
PF: predicated region fallthrough
CT: control target
= control target key end

     0   :  { %8 = vsyncpa [#allocation3], 0  ;;  %s820_s0 = inlined_call_operand.hbm [shape: f32[8,64], index: 0, kind: input, shape index: {}]   ;;  %s821_s1 = inlined_call_operand.hbm [shape: bf16[448,128], index: 1, kind: input, shape index: {}]   ;;  %s822_s2 = inlined_call_operand.hbm [shape: f32[8,128], index: 2, kind: input, shape index: {}]   ;;  %s823_s3 = inlined_call_operand.vmem [shape: f32[8,2], index: 3, kind: output, shape index: {}]  }
   0x1   :  { %9 = vsyncpa [#allocation5], 0  ;;  %s718_s12 = smov [#allocation4]   ;;  %s648_s16 = scalar_lea.hbm %s821_s1, 3584 }
   0x2   :  { %s25_s13 = sshll.u32 %s718_s12, 4  ;;  %p649_p0 = scmp.ne.s32.totalorder %s821_s1, %s648_s16  ;;  %s26_s13 = int_to_ptr.vmem [resolvable:$true] %s25_s13 }
   0x3   :  { %p652_p1 = scmp.lt.u32.totalorder %s648_s16, %s821_s1 }
   0x5   :  { %p654_p2 = pnand %p652_p1, %p649_p0 }
   0x7   :  { %657 = shalt.err (!%p654_p2)
}
   0x8   :  { %s658_s21 = scalar_lea.vmem %s26_s13, 3584  ;;  %p663_p4 = scmp.lt.s32.totalorder %s26_s13, %s26_s13 }
   0x9   :  { %p659_p3 = scmp.ne.s32.totalorder %s26_s13, %s658_s21  ;;  %p664_p5 = scmp.lt.s32.totalorder %s658_s21, %s658_s21 }
   0xb   :  { %p665_p6 = por %p664_p5, %p663_p4 }
   0xd   :  { %p666_p7 = pnand %p665_p6, %p659_p3 }
   0xf   :  { %669 = shalt.err (!%p666_p7)
}
  0x10   :  { %s719_s22 = smov 64   ;;  %s720_s23 = smov 4  }
  0x11   :  { %31 = dma.hbm_to_vmem [thread:$0]  %s821_s1, 3584, %s26_s13, [#allocation5], %s719_s22, %s719_s22, %s720_s23  }
  0x12   :  { %s721_s26 = smov [#allocation2]   ;;  %s722_s28 = smov [#allocation6]  }
  0x13   :  { %s16_s27 = sshll.u32 %s721_s26, 4  ;;  %s38_s29 = sshll.u32 %s722_s28, 4  ;;  %s17_s27 = int_to_ptr.vmem [resolvable:$true] %s16_s27  ;;  %s39_s29 = int_to_ptr.vmem [resolvable:$true] %s38_s29 }
  0x14   :  { %s670_s5 = scalar_lea.hbm %s820_s0, 128 }
  0x15   :  { %p671_p8 = scmp.ne.s32.totalorder %s820_s0, %s670_s5  ;;  %p674_p9 = scmp.lt.u32.totalorder %s670_s5, %s820_s0 }
  0x17   :  { %p676_p10 = pnand %p674_p9, %p671_p8 }
  0x19   :  { %679 = shalt.err (!%p676_p10)
}
  0x1a   :  { %s680_s1 = scalar_lea.vmem %s17_s27, 128  ;;  %p685_p12 = scmp.lt.s32.totalorder %s17_s27, %s17_s27 }
  0x1b   :  { %p681_p11 = scmp.ne.s32.totalorder %s17_s27, %s680_s1  ;;  %p686_p13 = scmp.lt.s32.totalorder %s680_s1, %s680_s1 }
  0x1d   :  { %p687_p0 = por %p686_p13, %p685_p12 }
  0x1f   :  { %p688_p1 = pnand %p687_p0, %p681_p11 }
  0x21   :  { %691 = shalt.err (!%p688_p1)
}
  0x22   :  { %19 = dma.hbm_to_vmem [thread:$0]  %s820_s0, 128, %s17_s27, [#allocation3]  }
  0x23   :  { %s692_s14 = scalar_lea.hbm %s822_s2, 128 }
  0x24   :  { %p693_p2 = scmp.ne.s32.totalorder %s822_s2, %s692_s14  ;;  %p696_p3 = scmp.lt.u32.totalorder %s692_s14, %s822_s2 }
  0x26   :  { %p698_p4 = pnand %p696_p3, %p693_p2 }
  0x28   :  { %701 = shalt.err (!%p698_p4)
}
  0x29   :  { %s702_s19 = scalar_lea.vmem %s39_s29, 128  ;;  %p707_p6 = scmp.lt.s32.totalorder %s39_s29, %s39_s29 }
  0x2a   :  { %p703_p5 = scmp.ne.s32.totalorder %s39_s29, %s702_s19  ;;  %p708_p7 = scmp.lt.s32.totalorder %s702_s19, %s702_s19 }
  0x2c   :  { %p709_p8 = por %p708_p7, %p707_p6 }
  0x2e   :  { %p710_p9 = pnand %p709_p8, %p703_p5 }
  0x30   :  { %713 = shalt.err (!%p710_p9)
}
  0x31   :  { %41 = dma.hbm_to_vmem [thread:$0]  %s822_s2, 128, %s39_s29, [#allocation5]  }
  0x32   :  { %714 = dma.done.wait [#allocation3], 128  }
  0x33   :  { %715 = vsyncadd [#allocation3], 4294967168 }
  0x34   :  { %716 = dma.done.wait [#allocation5], 3712  }
  0x35   :  { %717 = vsyncadd [#allocation5], 4294963584  ;;  %v723_v0 = vmov 0.0   ;;  %vm724_vm0 = vmmov 0   ;;  %v620_v1 = vld [vmem:[#allocation4] sm:$0xff]   ;;  %v621_v2 = vld [vmem:[#allocation4 + $0x8] sm:$0xff]  }
  0x36   :  { %541 = vmatprep.subr.bf16.mxu0 %v723_v0  ;;  %549 = vmatprep.mubr.msk.bf16.mxu0 %vm724_vm0, %v723_v0  ;;  %v624_v3 = vld [vmem:[#allocation4 + $0x20] sm:$0xff]   ;;  %v622_v4 = vld [vmem:[#allocation4 + $0x10] sm:$0xff]   ;;  %v625_v5 = vld [vmem:[#allocation4 + $0x28] sm:$0xff]   ;;  %vm142_vm1 = vcmask 523264   ;;  %vm468_vm2 = vcmask 15360  }
  0x37   :  { %553 = vmatprep.subr.bf16.mxu1 %v723_v0  ;;  %569 = vmatprep.mubr.msk.bf16.mxu1 %vm724_vm0, %v723_v0  ;;  %v623_v6 = vld [vmem:[#allocation4 + $0x18] sm:$0xff]   ;;  %v626_v8 = vld [vmem:[#allocation4 + $0x30] sm:$0xff]   ;;  %v628_v11 = vld [vmem:[#allocation4 + $0x40] sm:$0xff]  }
  0x38   :  { %542 = vmatpush3.bf16.msra.mxu0 %v620_v1  ;;  %554 = vmatpush3.bf16.msra.mxu1 %v624_v3  ;;  %v52_v7 = vld [vmem:[#allocation2] sm:$0xff]  ;;  %v629_v12 = vld [vmem:[#allocation4 + $0x48] sm:$0xff]   ;;  %v630_v13 = vld [vmem:[#allocation4 + $0x50] sm:$0xff]  }
  0x39   :  { %543 = vmatprep.subr.bf16.mxu0 %v723_v0  ;;  %555 = vmatprep.subr.bf16.mxu1 %v723_v0  ;;  %v53_v9 = vpack.c.bf16 %v52_v7, %v52_v7  ;;  %v627_v10 = vld [vmem:[#allocation4 + $0x38] sm:$0xff]   ;;  %v632_v15 = vld [vmem:[#allocation4 + $0x60] sm:$0xff]   ;;  %v633_v16 = vld [vmem:[#allocation4 + $0x68] sm:$0xff]  }
  0x3a   :  { %v631_v14 = vld [vmem:[#allocation4 + $0x58] sm:$0xff]   ;;  %v634_v17 = vld [vmem:[#allocation4 + $0x70] sm:$0xff]   ;;  %v636_v19 = vld [vmem:[#allocation4 + $0x80] sm:$0xff]  }
  0x3b   :  { %v635_v18 = vld [vmem:[#allocation4 + $0x78] sm:$0xff]   ;;  %v637_v20 = vld [vmem:[#allocation4 + $0x88] sm:$0xff]   ;;  %v476_v21 = vld [vmem:[#allocation6] ss:$0 sm:$0xff] }
  0x3c   :  { %544 = vmatpush3.bf16.msra.mxu0 %v621_v2  ;;  %556 = vmatpush3.bf16.msra.mxu1 %v625_v5  ;;  %v638_v29 = vld [vmem:[#allocation4 + $0x90] sm:$0xff]   ;;  %v639_v30 = vld [vmem:[#allocation4 + $0x98] sm:$0xff]   ;;  %v640_v31 = vld [vmem:[#allocation4 + $0xa0] sm:$0xff]  }
  0x3d   :  { %545 = vmatprep.subr.bf16.mxu0 %v723_v0  ;;  %557 = vmatprep.subr.bf16.mxu1 %v723_v0  ;;  %v641_v32 = vld [vmem:[#allocation4 + $0xa8] sm:$0xff]   ;;  %v642_v33 = vld [vmem:[#allocation4 + $0xb0] sm:$0xff]   ;;  %v643_v34 = vld [vmem:[#allocation4 + $0xb8] sm:$0xff]  }
  0x3e   :  { %v644_v35 = vld [vmem:[#allocation4 + $0xc0] sm:$0xff]   ;;  %v645_v36 = vld [vmem:[#allocation4 + $0xc8] sm:$0xff]   ;;  %v646_v45 = vld [vmem:[#allocation4 + $0xd0] sm:$0xff]  }
  0x3f   :  { %v482_v37 = vld [vmem:[#allocation6 + $0x1] ss:$0 sm:$0xff]  ;;  %v647_v46 = vld [vmem:[#allocation4 + $0xd8] sm:$0xff]   ;;  %v491_v47 = vld [vmem:[#allocation6 + $0x2] ss:$0 sm:$0xff] }
  0x40   :  { %546 = vmatpush3.bf16.msra.mxu0 %v622_v4  ;;  %558 = vmatpush3.bf16.msra.mxu1 %v626_v8  ;;  %v500_v55 = vld [vmem:[#allocation6 + $0x3] ss:$0 sm:$0xff] }
  0x41   :  { %547 = vmatprep.subr.bf16.mxu0 %v723_v0  ;;  %559 = vmatprep.subr.bf16.mxu1 %v723_v0 }
  0x44   :  { %548 = vmatpush3.bf16.msra.mxu0 %v623_v6  ;;  %560 = vmatpush3.bf16.msra.mxu1 %v627_v10 }
  0x45   :  { %573 = vmatprep.subr.bf16.mxu0 %v723_v0  ;;  %561 = vmatprep.subr.bf16.mxu1 %v723_v0 }
  0x47   :  { %550 = vmatmul.mubr.msk.bf16.vlgmr.msra.gmra.mrb[0].mxu0 %vm142_vm1, %v53_v9 }
  0x48   :  { %589 = vmatprep.mubr.msk.bf16.mxu0 %vm724_vm0, %v723_v0  ;;  %562 = vmatpush3.bf16.msra.mxu1 %v628_v11 }
  0x49   :  { %563 = vmatprep.subr.bf16.mxu1 %v723_v0  ;;  %574 = vmatpush3.bf16.msra.mxu0 %v632_v15 }
  0x4a   :  { %575 = vmatprep.subr.bf16.mxu0 %v723_v0 }
  0x4c   :  { %564 = vmatpush3.bf16.msra.mxu1 %v629_v12 }
  0x4d   :  { %565 = vmatprep.subr.bf16.mxu1 %v723_v0  ;;  %576 = vmatpush3.bf16.msra.mxu0 %v633_v16 }
  0x4e   :  { %577 = vmatprep.subr.bf16.mxu0 %v723_v0 }
  0x50   :  { %566 = vmatpush3.bf16.msra.mxu1 %v630_v13 }
  0x51   :  { %567 = vmatprep.subr.bf16.mxu1 %v723_v0  ;;  %578 = vmatpush3.bf16.msra.mxu0 %v634_v17 }
  0x52   :  { %579 = vmatprep.subr.bf16.mxu0 %v723_v0 }
  0x54   :  { %568 = vmatpush3.bf16.msra.mxu1 %v631_v14 }
  0x55   :  { %593 = vmatprep.subr.bf16.mxu1 %v723_v0  ;;  %580 = vmatpush3.bf16.msra.mxu0 %v635_v18 }
  0x56   :  { %581 = vmatprep.subr.bf16.mxu0 %v723_v0 }
  0x59   :  { %582 = vmatpush3.bf16.msra.mxu0 %v636_v19 }
  0x5a   :  { %583 = vmatprep.subr.bf16.mxu0 %v723_v0 }
  0x5d   :  { %584 = vmatpush3.bf16.msra.mxu0 %v637_v20 }
  0x5e   :  { %585 = vmatprep.subr.bf16.mxu0 %v723_v0 }
  0x61   :  { %586 = vmatpush3.bf16.msra.mxu0 %v638_v29 }
  0x62   :  { %587 = vmatprep.subr.bf16.mxu0 %v723_v0 }
  0x65   :  { %588 = vmatpush3.bf16.msra.mxu0 %v639_v30 }
 0x11a   :  { %v180_v22 = vpop.f32.mrb[0].mxu0 }
 0x11b   :  { %v181_v23 = vadd.f32 %v476_v21, %v180_v22  ;;  %v551_v24 = vpop.f32.mrb[1].mxu0 }
 0x11c   :  { %v183_v25 = vpop.f32.mrb[2].mxu0 }
 0x11d   :  { %v186_v26 = vmax.f32 %v181_v23, 0.0  ;;  %v552_v27 = vpop.f32.mrb[3].mxu0 }
 0x11f   :  { %v187_v28 = vpack.c.bf16 %v186_v26, %v186_v26 }
 0x121   :  { %570 = vmatmul.mubr.bf16.vlgmr.msra.gmra.mrb[0].mxu1 %v187_v28 }
 0x122   :  { %609 = vmatprep.mubr.msk.bf16.mxu1 %vm724_vm0, %v723_v0  ;;  %594 = vmatpush3.bf16.msra.mxu1 %v640_v31 }
 0x123   :  { %595 = vmatprep.subr.bf16.mxu1 %v723_v0 }
 0x126   :  { %596 = vmatpush3.bf16.msra.mxu1 %v641_v32 }
 0x127   :  { %597 = vmatprep.subr.bf16.mxu1 %v723_v0 }
 0x12a   :  { %598 = vmatpush3.bf16.msra.mxu1 %v642_v33 }
 0x12b   :  { %599 = vmatprep.subr.bf16.mxu1 %v723_v0 }
 0x12e   :  { %600 = vmatpush3.bf16.msra.mxu1 %v643_v34 }
 0x12f   :  { %601 = vmatprep.subr.bf16.mxu1 %v723_v0 }
 0x132   :  { %602 = vmatpush3.bf16.msra.mxu1 %v644_v35 }
 0x133   :  { %603 = vmatprep.subr.bf16.mxu1 %v723_v0 }
 0x136   :  { %604 = vmatpush3.bf16.msra.mxu1 %v645_v36 }
 0x137   :  { %605 = vmatprep.subr.bf16.mxu1 %v723_v0 }
 0x13a   :  { %606 = vmatpush3.bf16.msra.mxu1 %v646_v45 }
 0x13b   :  { %607 = vmatprep.subr.bf16.mxu1 %v723_v0 }
 0x13e   :  { %608 = vmatpush3.bf16.msra.mxu1 %v647_v46 }
 0x1f4   :  { %v274_v38 = vpop.f32.mrb[0].mxu1 }
 0x1f5   :  { %v275_v39 = vadd.f32 %v482_v37, %v274_v38  ;;  %v571_v40 = vpop.f32.mrb[1].mxu1 }
 0x1f6   :  { %v277_v41 = vpop.f32.mrb[2].mxu1 }
 0x1f7   :  { %v280_v42 = vmax.f32 %v275_v39, 0.0  ;;  %v572_v43 = vpop.f32.mrb[3].mxu1 }
 0x1f9   :  { %v281_v44 = vpack.c.bf16 %v280_v42, %v280_v42 }
 0x1fb   :  { %590 = vmatmul.mubr.bf16.vlgmr.msra.gmra.mrb[4].mxu0 %v281_v44 }
 0x2ce   :  { %v368_v48 = vpop.f32.mrb[4].mxu0 }
 0x2cf   :  { %v369_v49 = vadd.f32 %v491_v47, %v368_v48  ;;  %v591_v50 = vpop.f32.mrb[5].mxu0 }
 0x2d0   :  { %v371_v51 = vpop.f32.mrb[6].mxu0 }
 0x2d1   :  { %v374_v52 = vmax.f32 %v369_v49, 0.0  ;;  %v592_v53 = vpop.f32.mrb[7].mxu0 }
 0x2d3   :  { %v375_v54 = vpack.c.bf16 %v374_v52, %v374_v52 }
 0x2d5   :  { %610 = vmatmul.mubr.bf16.vlgmr.msra.gmra.mrb[4].mxu1 %v375_v54 }
 0x3a8   :  { %v462_v56 = vpop.f32.mrb[4].mxu1 }
 0x3a9   :  { %v463_v57 = vadd.f32 %v500_v55, %v462_v56  ;;  %v611_v58 = vpop.f32.mrb[5].mxu1 }
 0x3aa   :  { %v465_v59 = vpop.f32.mrb[6].mxu1 }
 0x3ab   :  { %469 = vst.msk [vmem:[%s823_s3] sm:$0xff] %vm468_vm2, %v463_v57  ;;  %v612_v60 = vpop.f32.mrb[7].mxu1 }
 0x3ac   :  { %474 = vsyncpa [#allocation3], 1 }
 0x3ad   :  { %475 = vsyncpa [#allocation5], 1 }

</bundles_post_ra>
